<compile_context>
chip_gen: v6e
topology: v6e:2x2x1
jax: 0.10.0
libtpu: 0.0.40
codegen_flags: <defaults>
</compile_context>

<pallas_src>
import jax
import jax.numpy as jnp
import numpy as np
from jax.experimental import pallas as pl
from jax.experimental.pallas import tpu as pltpu


# ----------------------------------------------------------------------------
# Pallas kernel: one grid step processes Bt batches (batch axis "parallel").
# ----------------------------------------------------------------------------
def _mesh_smooth_kernel(adj_ref, inv_ref, vt_ref, lapnorm_ref):
    bt = vt_ref.shape[0]
    n = vt_ref.shape[2]

    xt = vt_ref[...]                                # (Bt, 8, N) f32; rows 0..2
                                                    # coords^T, rows 3..7 zero.
    x2 = xt.reshape(bt * 8, n)                      # layout-free (sublane tile = 8)

    # Single bf16 MXU matmul with Bt*8 LHS rows; f32 accumulation.
    ns = jnp.dot(x2.astype(jnp.bfloat16), adj_ref[...],
                 preferred_element_type=jnp.float32)        # (Bt*8, N)

    # Exact precomputed 1/deg, broadcast across sublanes (degree-0 columns of
    # the adjacency are all zero, so lap = -x_i falls out automatically).
    lap = ns * inv_ref[...] - x2                            # (Bt*8, N) f32
    sq = (lap * lap).reshape(bt, 8, n)                      # pad rows are 0

    # Channel reduction on the XLU (sublane reduce within each batch group),
    # lane-dense (Bt, 1, N) output.
    lapnorm_ref[...] = jnp.sqrt(jnp.sum(sq, axis=1, keepdims=True))


# ----------------------------------------------------------------------------
# Connectivity preprocessing (JAX scatter, outside the kernel).
# ----------------------------------------------------------------------------
def _build_adjacency(faces, n_verts):
    f = faces.astype(jnp.int32)
    src = jnp.concatenate([f[:, 0], f[:, 1], f[:, 2]])
    dst = jnp.concatenate([f[:, 1], f[:, 2], f[:, 0]])
    adj = jnp.zeros((n_verts, n_verts), jnp.float32)
    adj = adj.at[src, dst].set(1.0)
    adj = adj.at[dst, src].set(1.0)
    return adj


def _pick_block_batches(batch, max_bt=16):
    """Largest divisor of `batch` <= max_bt (Bt*8 LHS rows per MXU pass)."""
    best = 1
    for d in range(1, min(batch, max_bt) + 1):
        if batch % d == 0:
            best = d
    return best


# ----------------------------------------------------------------------------
# Wrapper (equivalent to MeshSmoothLoss(metric).forward(vert1, face);
# the `metric` constructor arg is unused by the module's forward).
# ----------------------------------------------------------------------------
@jax.jit
def mesh_smooth_loss(verts, faces):
    verts = verts.astype(jnp.float32)
    B, N, C = verts.shape
    assert C == 3

    adj = _build_adjacency(faces, N)                          # (N, N) 0/1 f32
    deg = jnp.sum(adj, axis=0)                                # (N,) symmetric
    inv_deg = jnp.where(deg > 0.0, 1.0 / jnp.maximum(deg, 1.0), 1.0)
    inv_deg = inv_deg.reshape(1, N).astype(jnp.float32)       # exact f32 1/deg
    adj_bf16 = adj.astype(jnp.bfloat16)                       # 0/1 exact in bf16

    # Channel-major, 8-sublane-padded slab: rows 0..2 coords^T, rows 3..7 zero.
    vt = jnp.transpose(verts, (0, 2, 1))                      # (B, 3, N)
    slab = jnp.concatenate(
        [vt, jnp.zeros((B, 5, N), jnp.float32)], axis=1)      # (B, 8, N)

    bt = _pick_block_batches(B)                               # Bt batches / step
    grid = (B // bt,)

    grid_spec = pltpu.PrefetchScalarGridSpec(
        num_scalar_prefetch=0,
        grid=grid,
        in_specs=[
            # Grid-invariant adjacency: single VMEM buffer (no double-buffer).
            pl.BlockSpec((N, N), lambda b: (0, 0),
                         pipeline_mode=pl.Buffered(1)),
            # Grid-invariant exact 1/deg row.
            pl.BlockSpec((1, N), lambda b: (0, 0)),
            # Bt stacked batches of channel-major coords.
            pl.BlockSpec((bt, 8, N), lambda b: (b, 0, 0)),
        ],
        out_specs=pl.BlockSpec((bt, 1, N), lambda b: (b, 0, 0)),
    )

    lapnorm = pl.pallas_call(
        _mesh_smooth_kernel,
        out_shape=jax.ShapeDtypeStruct((B, 1, N), jnp.float32),
        grid_spec=grid_spec,
        compiler_params=pltpu.CompilerParams(
            dimension_semantics=("parallel",),
            # Above the 16/32 MiB scoped defaults, below every chip's physical
            # VMEM (v7x: 64 MiB) — keeps the large single-buffered A block.
            vmem_limit_bytes=48 * 1024 * 1024),
    )(adj_bf16, inv_deg, slab)

    # Mean of the per-vertex Laplacian norms, finalized in the wrapper
    # (no 1-lane per-step output).
    loss = jnp.sum(lapnorm) / jnp.float32(B * N)
    return loss, lapnorm[:, 0, :]


# ----------------------------------------------------------------------------
# Pure-JAX reference for validation.
# ----------------------------------------------------------------------------
def reference_loss(verts, faces):
    verts = verts.astype(jnp.float32)
    B, N, C = verts.shape
    adj = _build_adjacency(faces, N)
    deg = jnp.sum(adj, axis=1)
    inv = jnp.where(deg > 0, 1.0 / jnp.maximum(deg, 1.0), 0.0)
    ns = jnp.einsum("ij,bjc->bic", adj, verts)
    lap = ns * inv[None, :, None] - verts
    lapnorm = jnp.sqrt(jnp.sum(lap * lap, axis=-1))           # (B, N)
    return jnp.mean(lapnorm), lapnorm


if __name__ == "__main__":
    # Small deterministic problem: a 16x16 grid mesh (256 vertices, 450 faces),
    # batch of 2 vertex sets.
    B = 2
    g = 16
    N = g * g
    C = 3

    idx = np.arange(N).reshape(g, g)
    v00 = idx[:-1, :-1].ravel()
    v01 = idx[:-1, 1:].ravel()
    v10 = idx[1:, :-1].ravel()
    v11 = idx[1:, 1:].ravel()
    faces_np = np.concatenate(
        [np.stack([v00, v10, v01], axis=-1),
         np.stack([v01, v10, v11], axis=-1)], axis=0).astype(np.int32)
    faces = jnp.asarray(faces_np)

    key = jax.random.PRNGKey(0)
    verts = jax.random.uniform(key, (B, N, C), dtype=jnp.float32)

    loss, lapnorm = mesh_smooth_loss(verts, faces)
    jax.block_until_ready(loss)

    r_loss, r_lapnorm = reference_loss(verts, faces)

    # bf16 matmul inputs bound the per-vertex abs error to a few 1e-3.
    np.testing.assert_allclose(np.asarray(lapnorm), np.asarray(r_lapnorm),
                               rtol=2e-2, atol=6e-3)
    np.testing.assert_allclose(float(loss), float(r_loss),
                               rtol=2e-2, atol=2e-3)

    print("KERNEL_OK")
</pallas_src>

<mosaic_0001>
module attributes {stable_mosaic.version = 11 : i64} {
  func.func @_mesh_smooth_kernel(%arg0: i32, %arg1: memref<256x256xbf16, #tpu.memory_space<vmem>>, %arg2: memref<1x256xf32, #tpu.memory_space<vmem>>, %arg3: memref<2x8x256xf32, #tpu.memory_space<vmem>>, %arg4: memref<2x1x256xf32, #tpu.memory_space<vmem>>) attributes {dimension_semantics = [#tpu.dimension_semantics<parallel>], iteration_bounds = array<i64: 1>, scalar_prefetch = 0 : i64, scratch_operands = 0 : i64, tpu.core_type = #tpu.core_type<tc>, window_params = [{pipeline_mode = #tpu.pipeline_mode<synchronous>, transform_indices = @transform_0, window_bounds = array<i64: 256, 256>}, {pipeline_mode = #tpu.pipeline_mode<synchronous>, transform_indices = @transform_1, window_bounds = array<i64: 1, 256>}, {transform_indices = @transform_2, window_bounds = array<i64: 2, 8, 256>}, {transform_indices = @transform_3, window_bounds = array<i64: 2, 1, 256>}]} {
    %c0 = arith.constant 0 : index
    %c0_0 = arith.constant 0 : index
    %c0_1 = arith.constant 0 : index
    %0 = vector.load %arg3[%c0, %c0_0, %c0_1] : memref<2x8x256xf32, #tpu.memory_space<vmem>>, vector<2x8x256xf32>
    %1 = vector.shape_cast %0 : vector<2x8x256xf32> to vector<16x256xf32>
    %2 = arith.truncf %1 : vector<16x256xf32> to vector<16x256xbf16>
    %c0_2 = arith.constant 0 : index
    %c0_3 = arith.constant 0 : index
    %3 = vector.load %arg1[%c0_2, %c0_3] : memref<256x256xbf16, #tpu.memory_space<vmem>>, vector<256x256xbf16>
    %cst = arith.constant dense<0.000000e+00> : vector<16x256xf32>
    %4 = tpu.matmul %2, %3, %cst {dimension_numbers = #tpu.dot_dimension_numbers<[1], [0], [0], [1], [0, 0, 1, 1], [], []>} : vector<16x256xbf16>, vector<256x256xbf16>, vector<16x256xf32> -> vector<16x256xf32>
    %c0_4 = arith.constant 0 : index
    %c0_5 = arith.constant 0 : index
    %5 = vector.load %arg2[%c0_4, %c0_5] : memref<1x256xf32, #tpu.memory_space<vmem>>, vector<1x256xf32>
    %6 = vector.broadcast %5 : vector<1x256xf32> to vector<16x256xf32>
    %7 = arith.mulf %4, %6 : vector<16x256xf32>
    %8 = arith.subf %7, %1 : vector<16x256xf32>
    %9 = arith.mulf %8, %8 : vector<16x256xf32>
    %10 = vector.shape_cast %9 : vector<16x256xf32> to vector<2x8x256xf32>
    %cst_6 = arith.constant dense<0.000000e+00> : vector<2x256xf32>
    %11 = vector.multi_reduction <add>, %10, %cst_6 [1] : vector<2x8x256xf32> to vector<2x256xf32>
    %12 = vector.shape_cast %11 : vector<2x256xf32> to vector<2x1x256xf32>
    %13 = math.sqrt %12 : vector<2x1x256xf32>
    %c0_7 = arith.constant 0 : index
    %c0_8 = arith.constant 0 : index
    %c0_9 = arith.constant 0 : index
    %14 = vector.load %arg4[%c0_7, %c0_8, %c0_9] : memref<2x1x256xf32, #tpu.memory_space<vmem>>, vector<2x1x256xf32>
    tpu.vector_store %arg4[%c0_7, %c0_8, %c0_9], %13 {strides = array<i32>} : memref<2x1x256xf32, #tpu.memory_space<vmem>>, vector<2x1x256xf32>,
    return
  }
  func.func @transform_0(%arg0: i32) -> (i32, i32) {
    %c0_i32 = arith.constant 0 : i32
    %c0_i32_0 = arith.constant 0 : i32
    %c0_i32_1 = arith.constant 0 : i32
    return %c0_i32, %c0_i32_0 : i32, i32
  }
  func.func @transform_1(%arg0: i32) -> (i32, i32) {
    %c0_i32 = arith.constant 0 : i32
    %c0_i32_0 = arith.constant 0 : i32
    %c0_i32_1 = arith.constant 0 : i32
    return %c0_i32, %c0_i32_0 : i32, i32
  }
  func.func @transform_2(%arg0: i32) -> (i32, i32, i32) {
    %c0_i32 = arith.constant 0 : i32
    %c0_i32_0 = arith.constant 0 : i32
    %c0_i32_1 = arith.constant 0 : i32
    return %arg0, %c0_i32, %c0_i32_0 : i32, i32, i32
  }
  func.func @transform_3(%arg0: i32) -> (i32, i32, i32) {
    %c0_i32 = arith.constant 0 : i32
    %c0_i32_0 = arith.constant 0 : i32
    %c0_i32_1 = arith.constant 0 : i32
    return %arg0, %c0_i32, %c0_i32_0 : i32, i32, i32
  }
}

</mosaic_0001>

<bundles_post_ra>
// kernel: mesh_smooth_loss.1
= control target key start
LH: loop header
LB: loop body
LE: loop exit
PB: predicated region body
PF: predicated region fallthrough
CT: control target
= control target key end

     0   :  { %v257_v38 = vlaneseq  ;;  %s619_s0 = inlined_call_operand.vmem [shape: bf16[256,256], index: 0, kind: input, shape index: {}]   ;;  %s620_s2 = inlined_call_operand.vmem [shape: f32[2,8,256], index: 2, kind: input, shape index: {}]   ;;  %s621_s1 = inlined_call_operand.vmem [shape: f32[1,256], index: 1, kind: input, shape index: {}]   ;;  %s622_s3 = inlined_call_operand.vmem [shape: f32[2,1,256], index: 3, kind: output, shape index: {}]  }
   0x1   :  { %v410_v0 = vld [vmem:[%s619_s0 + $0x74] ss:$8 sps:$4 sm:$0xff]   ;;  %v412_v1 = vld [vmem:[%s619_s0 + $0x70] ss:$8 sps:$4 sm:$0xff]   ;;  %v413_v2 = vld [vmem:[%s619_s0 + $0x64] ss:$8 sps:$4 sm:$0xff]  }
   0x2   :  { %212 = vmatprep.subr.bf16.mxu0 %v410_v0  ;;  %v415_v3 = vld [vmem:[%s619_s0 + $0x60] ss:$8 sps:$4 sm:$0xff]   ;;  %v416_v4 = vld [vmem:[%s619_s0 + $0x54] ss:$8 sps:$4 sm:$0xff]   ;;  %v418_v5 = vld [vmem:[%s619_s0 + $0x50] ss:$8 sps:$4 sm:$0xff]  }
   0x3   :  { %213 = vmatpush1.bf16.msra.mxu0 %v412_v1  ;;  %v419_v6 = vld [vmem:[%s619_s0 + $0x44] ss:$8 sps:$4 sm:$0xff]   ;;  %v421_v7 = vld [vmem:[%s619_s0 + $0x40] ss:$8 sps:$4 sm:$0xff]   ;;  %v422_v8 = vld [vmem:[%s619_s0 + $0x34] ss:$8 sps:$4 sm:$0xff]  }
   0x4   :  { %214 = vmatprep.subr.bf16.mxu0 %v413_v2  ;;  %v424_v9 = vld [vmem:[%s619_s0 + $0x30] ss:$8 sps:$4 sm:$0xff]   ;;  %v425_v10 = vld [vmem:[%s619_s0 + $0x24] ss:$8 sps:$4 sm:$0xff]   ;;  %v427_v11 = vld [vmem:[%s619_s0 + $0x20] ss:$8 sps:$4 sm:$0xff]  }
   0x5   :  { %v428_v12 = vld [vmem:[%s619_s0 + $0x14] ss:$8 sps:$4 sm:$0xff]   ;;  %v529_v13 = vld [vmem:[%s620_s2 + $0x8] sm:$0xff]  ;;  %v430_v16 = vld [vmem:[%s619_s0 + $0x10] ss:$8 sps:$4 sm:$0xff]   ;;  %v602_v39 = vshrl.u32 %v257_v38, 7 }
   0x6   :  { %v534_v14 = vld [vmem:[%s620_s2 + $0x18] sm:$0xff]  ;;  %v431_v17 = vld [vmem:[%s619_s0 + $0x4] ss:$8 sps:$4 sm:$0xff]   ;;  %v433_v18 = vld [vmem:[%s619_s0] ss:$8 sps:$4 sm:$0xff]   ;;  %vm369_vm5 = vcmp.lt.s32.totalorder %v257_v38, 256 }
   0x7   :  { %215 = vmatpush1.bf16.msra.mxu0 %v415_v3  ;;  %v19_v15 = vpack.c.bf16 %v534_v14, %v529_v13  ;;  %v434_v19 = vld [vmem:[%s619_s0 + $0xf4] ss:$8 sps:$4 sm:$0xff]   ;;  %v436_v20 = vld [vmem:[%s619_s0 + $0xf0] ss:$8 sps:$4 sm:$0xff]   ;;  %v437_v21 = vld [vmem:[%s619_s0 + $0xe4] ss:$8 sps:$4 sm:$0xff]  }
   0x8   :  { %216 = vmatprep.subr.bf16.mxu0 %v416_v4  ;;  %v439_v22 = vld [vmem:[%s619_s0 + $0xe0] ss:$8 sps:$4 sm:$0xff]   ;;  %v440_v23 = vld [vmem:[%s619_s0 + $0xd4] ss:$8 sps:$4 sm:$0xff]   ;;  %v442_v24 = vld [vmem:[%s619_s0 + $0xd0] ss:$8 sps:$4 sm:$0xff]  }
   0x9   :  { %244 = vmatprep.mubr.bf16.mxu0 %v19_v15  ;;  %v443_v25 = vld [vmem:[%s619_s0 + $0xc4] ss:$8 sps:$4 sm:$0xff]   ;;  %v445_v26 = vld [vmem:[%s619_s0 + $0xc0] ss:$8 sps:$4 sm:$0xff]   ;;  %v446_v27 = vld [vmem:[%s619_s0 + $0xb4] ss:$8 sps:$4 sm:$0xff]  }
   0xa   :  { %v448_v28 = vld [vmem:[%s619_s0 + $0xb0] ss:$8 sps:$4 sm:$0xff]   ;;  %v449_v29 = vld [vmem:[%s619_s0 + $0xa4] ss:$8 sps:$4 sm:$0xff]   ;;  %v451_v30 = vld [vmem:[%s619_s0 + $0xa0] ss:$8 sps:$4 sm:$0xff]  }
   0xb   :  { %217 = vmatpush1.bf16.msra.mxu0 %v418_v5  ;;  %v452_v31 = vld [vmem:[%s619_s0 + $0x94] ss:$8 sps:$4 sm:$0xff]   ;;  %v454_v32 = vld [vmem:[%s619_s0 + $0x90] ss:$8 sps:$4 sm:$0xff]   ;;  %v455_v33 = vld [vmem:[%s619_s0 + $0x84] ss:$8 sps:$4 sm:$0xff]  }
   0xc   :  { %218 = vmatprep.subr.bf16.mxu0 %v419_v6  ;;  %v457_v34 = vld [vmem:[%s619_s0 + $0x80] ss:$8 sps:$4 sm:$0xff]   ;;  %v16_v36 = vld [vmem:[%s620_s2 + $0x10] sm:$0xff]  ;;  %v259_v40 = vsub.s32 0, %v602_v39  ;;  %v263_v42 = vsub.s32 1, %v602_v39 }
   0xd   :  { %v14_v35 = vld [vmem:[%s620_s2] sm:$0xff] }
   0xe   :  { %v18_v37 = vpack.c.bf16 %v16_v36, %v14_v35  ;;  %v255_v41 = vld [vmem:[%s621_s1] sm:$0x3] }
   0xf   :  { %219 = vmatpush1.bf16.msra.mxu0 %v421_v7  ;;  %v260_v43 = vrot.slane %v255_v41, %v259_v40  ;;  %v264_v44 = vrot.slane %v255_v41, %v263_v42 }
  0x10   :  { %220 = vmatprep.subr.bf16.mxu0 %v422_v8 }
  0x13   :  { %221 = vmatpush1.bf16.msra.mxu0 %v424_v9 }
  0x14   :  { %222 = vmatprep.subr.bf16.mxu0 %v425_v10 }
  0x17   :  { %223 = vmatpush1.bf16.msra.mxu0 %v427_v11 }
  0x18   :  { %224 = vmatprep.subr.bf16.mxu0 %v428_v12 }
  0x1b   :  { %225 = vmatpush1.bf16.msra.mxu0 %v430_v16 }
  0x1c   :  { %226 = vmatprep.subr.bf16.mxu0 %v431_v17 }
  0x1f   :  { %227 = vmatpush1.bf16.msra.mxu0 %v433_v18 }
  0x20   :  { %228 = vmatprep.subr.bf16.mxu0 %v434_v19 }
  0x23   :  { %229 = vmatpush2.bf16.msra.mxu0 %v436_v20 }
  0x24   :  { %230 = vmatprep.subr.bf16.mxu0 %v437_v21  ;;  %v466_v21 = vmov 1966171168  }
  0x27   :  { %231 = vmatpush2.bf16.msra.mxu0 %v439_v22  ;;  %v337_v22 = vunpack.c.l.s4 %v466_v21 }
  0x28   :  { %232 = vmatprep.subr.bf16.mxu0 %v440_v23 }
  0x2b   :  { %233 = vmatpush2.bf16.msra.mxu0 %v442_v24 }
  0x2c   :  { %234 = vmatprep.subr.bf16.mxu0 %v443_v25  ;;  %v338_v25 = vunpack.c.0.s8 %v337_v22 }
  0x2f   :  { %235 = vmatpush2.bf16.msra.mxu0 %v445_v26 }
  0x30   :  { %236 = vmatprep.subr.bf16.mxu0 %v446_v27 }
  0x33   :  { %237 = vmatpush2.bf16.msra.mxu0 %v448_v28 }
  0x34   :  { %238 = vmatprep.subr.bf16.mxu0 %v449_v29 }
  0x37   :  { %239 = vmatpush2.bf16.msra.mxu0 %v451_v30 }
  0x38   :  { %240 = vmatprep.subr.bf16.mxu0 %v452_v31 }
  0x3b   :  { %241 = vmatpush2.bf16.msra.mxu0 %v454_v32  ;;  %v341_v32 = vsub.s32 %v338_v25, %v602_v39 }
  0x3c   :  { %242 = vmatprep.subr.bf16.mxu0 %v455_v33 }
  0x3f   :  { %243 = vmatpush2.bf16.msra.mxu0 %v457_v34 }
  0x42   :  { %245 = vmatmul.mubr.bf16.vlgmr.msra.gmra.mxu0 %v18_v37 }
 0x102   :  { %v246_v45 = vpop.f32.mrf.mxu0 }
 0x103   :  { %v267_v46 = vmul.f32 %v260_v43, %v246_v45 }
 0x104   :  { %v248_v47 = vpop.f32.mrf.mxu0 }
 0x105   :  { %v271_v48 = vsub.f32 %v267_v46, %v14_v35  ;;  %v268_v49 = vmul.f32 %v264_v44, %v248_v47 }
 0x106   :  { %v250_v50 = vpop.f32.mrf.mxu0 }
 0x107   :  { %v275_v51 = vmul.f32 %v271_v48, %v271_v48  ;;  %v272_v52 = vsub.f32 %v268_v49, %v529_v13  ;;  %v269_v53 = vmul.f32 %v260_v43, %v250_v50 }
 0x108   :  { %v252_v54 = vpop.f32.mrf.mxu0 }
 0x109   :  { %v279_v55 = vrot.slane %v275_v51, 4  ;;  %v276_v56 = vmul.f32 %v272_v52, %v272_v52  ;;  %v273_v57 = vsub.f32 %v269_v53, %v16_v36  ;;  %v270_v58 = vmul.f32 %v264_v44, %v252_v54 }
 0x10b   :  { %v280_v59 = vadd.f32 %v279_v55, %v275_v51  ;;  %v285_v60 = vrot.slane %v276_v56, 4  ;;  %v277_v61 = vmul.f32 %v273_v57, %v273_v57  ;;  %v274_v62 = vsub.f32 %v270_v58, %v534_v14 }
 0x10d   :  { %v281_v63 = vrot.slane %v280_v59, 2  ;;  %v286_v0 = vadd.f32 %v285_v60, %v276_v56  ;;  %v291_v1 = vrot.slane %v277_v61, 4  ;;  %v278_v2 = vmul.f32 %v274_v62, %v274_v62 }
 0x10f   :  { %v282_v3 = vadd.f32 %v281_v63, %v280_v59  ;;  %v287_v4 = vrot.slane %v286_v0, 2  ;;  %v292_v5 = vadd.f32 %v291_v1, %v277_v61  ;;  %v297_v6 = vrot.slane %v278_v2, 4 }
 0x111   :  { %v283_v7 = vrot.slane %v282_v3, 1  ;;  %v288_v8 = vadd.f32 %v287_v4, %v286_v0  ;;  %v293_v9 = vrot.slane %v292_v5, 2  ;;  %v298_v10 = vadd.f32 %v297_v6, %v278_v2 }
 0x113   :  { %v284_v11 = vadd.f32 %v283_v7, %v282_v3  ;;  %v289_v12 = vrot.slane %v288_v8, 1  ;;  %v294_v13 = vadd.f32 %v293_v9, %v292_v5  ;;  %v299_v15 = vrot.slane %v298_v10, 2 }
 0x115   :  { %458 = vrsqrt.f32 %v284_v11  ;;  %v290_v16 = vadd.f32 %v289_v12, %v288_v8  ;;  %v295_v17 = vrot.slane %v294_v13, 1  ;;  %v300_v14 = vadd.f32 %v299_v15, %v298_v10 }
 0x116   :  { %vm305_vm0 = vcmp.eq.f32.partialorder %v284_v11, inf  ;;  %v308_v29 = vand.u32 2147483648, %v284_v11  ;;  %vm307_vm2 = vcmp.eq.f32.partialorder %v284_v11, 0.0 }
 0x117   :  { %460 = vrsqrt.f32 %v290_v16  ;;  %v296_v18 = vadd.f32 %v295_v17, %v294_v13  ;;  %v301_v19 = vrot.slane %v300_v14, 1  ;;  %vm312_vm1 = vcmp.eq.f32.partialorder %v290_v16, inf }
 0x118   :  { %v315_v30 = vand.u32 2147483648, %v290_v16  ;;  %vm314_vm3 = vcmp.eq.f32.partialorder %v290_v16, 0.0 }
 0x119   :  { %462 = vrsqrt.f32 %v296_v18  ;;  %v302_v20 = vadd.f32 %v301_v19, %v300_v14  ;;  %vm319_vm4 = vcmp.eq.f32.partialorder %v296_v18, inf  ;;  %v322_v44 = vand.u32 2147483648, %v296_v18 }
 0x11a   :  { %vm321_vm7 = vcmp.eq.f32.partialorder %v296_v18, 0.0 }
 0x11b   :  { %464 = vrsqrt.f32 %v302_v20  ;;  %vm326_vm6 = vcmp.eq.f32.partialorder %v302_v20, inf  ;;  %v329_v45 = vand.u32 2147483648, %v302_v20  ;;  %vm328_vm8 = vcmp.eq.f32.partialorder %v302_v20, 0.0 }
 0x122   :  { %v459_v23 = vpop.eup %458 }
 0x123   :  { %v304_v24 = vmul.f32 %v459_v23, %v284_v11 }
 0x124   :  { %v461_v26 = vpop.eup %460 }
 0x125   :  { %v306_v27 = vsel %vm305_vm0, %v284_v11, %v304_v24  ;;  %v311_v28 = vmul.f32 %v461_v26, %v290_v16 }
 0x126   :  { %v463_v31 = vpop.eup %462  ;;  %v309_v34 = vsel %vm307_vm2, %v308_v29, %v306_v27 }
 0x127   :  { %v313_v33 = vsel %vm312_vm1, %v290_v16, %v311_v28  ;;  %v318_v36 = vmul.f32 %v463_v31, %v296_v18 }
 0x128   :  { %v316_v35 = vsel %vm314_vm3, %v315_v30, %v313_v33  ;;  %v465_v40 = vpop.eup %464 }
 0x129   :  { %v335_v37 = vcombine.low %v309_v34, %v316_v35  ;;  %v320_v42 = vsel %vm319_vm4, %v296_v18, %v318_v36  ;;  %v325_v43 = vmul.f32 %v465_v40, %v302_v20 }
 0x12a   :  { %v323_v39 = vsel %vm321_vm7, %v322_v44, %v320_v42 }
 0x12b   :  { %v342_v41 = vrot.slane %v335_v37, %v341_v32  ;;  %v327_v47 = vsel %vm326_vm6, %v302_v20, %v325_v43 }
 0x12c   :  { %v330_v48 = vsel %vm328_vm8, %v329_v45, %v327_v47 }
 0x12d   :  { %v349_v46 = vrot.slane %v342_v41, %v341_v32  ;;  %v350_v49 = vcombine.low %v323_v39, %v330_v48 }
 0x12f   :  { %371 = vst.msk [vmem:[%s622_s3] sm:$0x3] %vm369_vm5, %v349_v46  ;;  %v357_v50 = vrot.slane %v350_v49, %v341_v32 }
 0x131   :  { %v364_v51 = vrot.slane %v357_v50, %v341_v32 }
 0x133   :  { %372 = vst.msk [vmem:[%s622_s3 + $0x2] sm:$0x3] %vm369_vm5, %v364_v51 }

</bundles_post_ra>
